<compile_context>
chip_gen: v7x
topology: tpu7x:2x2x1
jax: 0.10.0
libtpu: 0.0.40
codegen_flags: <defaults>
</compile_context>

<pallas_src>
import functools

import jax
import jax.numpy as jnp
from jax.experimental import pallas as pl
from jax.experimental.pallas import tpu as pltpu


def _round_up(x, m):
    return ((x + m - 1) // m) * m


def _sublane_for(dtype):
    # Minimum second-to-last tile dim per dtype on TPU.
    return {4: 8, 2: 16, 1: 32}[jnp.dtype(dtype).itemsize]


def _vmem_limit_bytes():
    """Generation-aware scoped-VMEM target (bytes)."""
    try:
        cap = int(pltpu.get_tpu_info().vmem_capacity_bytes)
    except Exception:
        cap = 64 * 1024 * 1024  # conservative (v7x-sized) fallback
    # ~96 MiB on v5e/v6e (128 MiB physical), ~48 MiB on v7x (64 MiB per TC).
    return int(min(cap * 3 // 4, 100 * 1024 * 1024))


# --------------------------------------------------------------------------- #
# Kernels
# --------------------------------------------------------------------------- #
def _make_fused_kernel(compute_dtype):
    """Single-pass kernel: the whole in_dim is resident per batch tile.

    x_ref : (TM, in_dim)
    w1_ref: (in_dim, HP)  b1_ref: (1, HP)     (HP = hidden padded to 128)
    w2_ref: (HP, HP)      b2_ref: (1, HP)
    w3_ref: (HP, 1)       b3_ref: (1, 1)
    o_ref : (TM, 1)
    """

    def kernel(x_ref, w1_ref, b1_ref, w2_ref, b2_ref, w3_ref, b3_ref, o_ref):
        x = x_ref[...]
        w1 = w1_ref[...]
        w2 = w2_ref[...]
        w3 = w3_ref[...]
        if compute_dtype is not None:
            x = x.astype(compute_dtype)
            w1 = w1.astype(compute_dtype)
            w2 = w2.astype(compute_dtype)
            w3 = w3.astype(compute_dtype)
        h1 = jnp.dot(x, w1, preferred_element_type=jnp.float32) + b1_ref[...]
        h1 = jnp.maximum(h1, 0.0)                       # ReLU (VPU)
        if compute_dtype is not None:
            h1 = h1.astype(compute_dtype)
        h2 = jnp.dot(h1, w2, preferred_element_type=jnp.float32) + b2_ref[...]
        h2 = jnp.maximum(h2, 0.0)                       # ReLU (VPU)
        if compute_dtype is not None:
            h2 = h2.astype(compute_dtype)
        out = jnp.dot(h2, w3, preferred_element_type=jnp.float32) + b3_ref[...]
        o_ref[...] = out.astype(o_ref.dtype)

    return kernel


def _make_ktiled_kernel(compute_dtype):
    """K-tiled kernel: in_dim streamed in chunks; layer-1 pre-activation is
    accumulated in an f32 VMEM scratch; layers 2/3 run on the last K step."""

    def kernel(x_ref, w1_ref, b1_ref, w2_ref, b2_ref, w3_ref, b3_ref, o_ref,
               acc_ref):
        k = pl.program_id(1)

        @pl.when(k == 0)
        def _():
            acc_ref[...] = jnp.zeros_like(acc_ref)

        xk = x_ref[...]
        w1k = w1_ref[...]
        if compute_dtype is not None:
            xk = xk.astype(compute_dtype)
            w1k = w1k.astype(compute_dtype)
        acc_ref[...] += jnp.dot(xk, w1k, preferred_element_type=jnp.float32)

        @pl.when(k == pl.num_programs(1) - 1)
        def _():
            w2 = w2_ref[...]
            w3 = w3_ref[...]
            h1 = jnp.maximum(acc_ref[...] + b1_ref[...], 0.0)
            if compute_dtype is not None:
                h1 = h1.astype(compute_dtype)
            h2 = jnp.dot(h1, w2, preferred_element_type=jnp.float32) + b2_ref[...]
            h2 = jnp.maximum(h2, 0.0)
            if compute_dtype is not None:
                h2 = h2.astype(compute_dtype)
            out = jnp.dot(h2, w3, preferred_element_type=jnp.float32) + b3_ref[...]
            o_ref[...] = out.astype(o_ref.dtype)

    return kernel


# --------------------------------------------------------------------------- #
# Wrapper
# --------------------------------------------------------------------------- #
@functools.partial(
    jax.jit,
    static_argnames=("in_dim", "hidden_dim", "tm", "compute_dtype", "k_tile"))
def cscalar_forward(x, params, *, in_dim, hidden_dim, tm=4096,
                    compute_dtype=None, k_tile=None):
    """Pallas-backed CScalar forward.  Returns (N, 1) with N = x.size // in_dim
    (mirrors x.view(-1, in_dim) in the PyTorch module).

    compute_dtype: None (exact f32, default) or "bfloat16" (bf16 operands with
        f32 accumulation -- the big lever on v5e / v7x if accuracy allows).
    k_tile: force the K-tiled path with this in_dim chunk size (test knob);
        it is otherwise auto-selected only for very wide in_dim.
    """
    w1, b1, w2, b2, w3, b3 = params
    cdt = None if compute_dtype is None else jnp.dtype(compute_dtype)

    # --- activations: flatten only (x is streamed through HBM exactly once) --
    x2 = x.reshape(-1, in_dim)
    if x2.dtype not in (jnp.dtype(jnp.float32), jnp.dtype(jnp.bfloat16)):
        x2 = x2.astype(jnp.float32)     # explicit, rare fallback (extra pass)
    n = x2.shape[0]
    itemsize = jnp.dtype(x2.dtype).itemsize
    sublane = _sublane_for(x2.dtype)    # 8 f32 / 16 bf16 / 32 int8
    n_rnd = _round_up(max(n, 1), sublane)

    # --- pad hidden dim to a full 128-lane width (bit-identical math) --------
    hp = _round_up(max(hidden_dim, 1), 128)
    ph = hp - hidden_dim
    if ph:
        w1 = jnp.pad(w1, ((0, 0), (0, ph)))
        b1 = jnp.pad(b1, ((0, 0), (0, ph)))
        w2 = jnp.pad(w2, ((0, ph), (0, ph)))
        b2 = jnp.pad(b2, ((0, 0), (0, ph)))
        w3 = jnp.pad(w3, ((0, ph), (0, 0)))
    if cdt is not None:
        # weights are tiny: cast once in HBM (halves their stream/VMEM);
        # biases stay f32 since they are added to the f32 accumulators.
        w1 = w1.astype(cdt)
        w2 = w2.astype(cdt)
        w3 = w3.astype(cdt)
    wsz = jnp.dtype(w1.dtype).itemsize

    # --- generation-aware VMEM budget ----------------------------------------
    vmem_limit = _vmem_limit_bytes()
    budget = int(vmem_limit * 0.85)            # headroom for internal scratch
    weight_bytes = (w1.size + w2.size + w3.size) * wsz \
                   + (b1.size + b2.size + b3.size) * 4
    resident_weight_bytes = 2 * weight_bytes   # default pipeline double-buffers

    # per batch-row VMEM cost of the single-pass path: 2x double-buffered x row
    # + h1/h2/matmul-accumulator intermediates (f32, hp lanes, ~4 copies)
    # + double-buffered f32 output element (+ the in-kernel bf16 x copy).
    per_row = 2 * in_dim * itemsize + 4 * hp * 4 + 2 * 4
    if cdt is not None:
        per_row += in_dim * jnp.dtype(cdt).itemsize
    tm_cap = (budget - resident_weight_bytes) // per_row

    use_ktiled = (k_tile is not None) or (tm_cap < 256)

    flops = 2 * n * (in_dim * hp + hp * hp + hp)

    if not use_ktiled:
        # ---- single-pass path ------------------------------------------------
        # Batch tile: as big as the VMEM budget allows, but keep >= ~8 grid
        # steps for large n (>= 4 per TensorCore on v7x megacore) without
        # dropping below a 512-row tile, and never beyond the (rounded) batch.
        grid8 = _round_up(-(-n // 8), sublane)
        tm_eff = min(tm, int(tm_cap), n_rnd)
        tm_eff = min(tm_eff, max(min(512, n_rnd), grid8))
        tm_eff = max(sublane, (tm_eff // sublane) * sublane)
        grid = (pl.cdiv(n, tm_eff),)
        # Partial last block: OOB x rows are garbage reads whose output rows
        # are discarded by Pallas' masked write-back of the partial out block.

        cost = pl.CostEstimate(
            flops=flops,
            transcendentals=0,
            bytes_accessed=int(n * in_dim * itemsize + n * 4 + weight_bytes),
        )
        return pl.pallas_call(
            _make_fused_kernel(cdt),
            out_shape=jax.ShapeDtypeStruct((n, 1), jnp.float32),
            grid_spec=pltpu.PrefetchScalarGridSpec(
                num_scalar_prefetch=0,
                grid=grid,
                in_specs=[
                    # activations: streamed over the batch axis
                    pl.BlockSpec((tm_eff, in_dim), lambda i: (i, 0)),
                    # weights / biases: constant block index -> resident in
                    # VMEM, never re-DMA'd across grid steps.
                    pl.BlockSpec((in_dim, hp), lambda i: (0, 0)),
                    pl.BlockSpec((1, hp), lambda i: (0, 0)),
                    pl.BlockSpec((hp, hp), lambda i: (0, 0)),
                    pl.BlockSpec((1, hp), lambda i: (0, 0)),
                    pl.BlockSpec((hp, 1), lambda i: (0, 0)),
                    pl.BlockSpec((1, 1), lambda i: (0, 0)),
                ],
                out_specs=pl.BlockSpec((tm_eff, 1), lambda i: (i, 0)),
            ),
            compiler_params=pltpu.CompilerParams(
                dimension_semantics=("parallel",),
                vmem_limit_bytes=vmem_limit),
            cost_estimate=cost,
        )(x2, w1, b1, w2, b2, w3, b3)

    # ---- K-tiled fallback path (very wide in_dim, or forced by k_tile) ------
    tm_k = min(tm, 512, n_rnd)
    tm_k = max(sublane, (tm_k // sublane) * sublane)

    if k_tile is not None:
        tk = _round_up(min(max(int(k_tile), 1), in_dim), 128)
    else:
        small_w = (w2.size + w3.size) * wsz + (b1.size + b2.size + b3.size) * 4
        fixed = 4 * tm_k * hp * 4 + 2 * small_w + 2 * tm_k * 4
        per_col = 2 * tm_k * itemsize + 2 * hp * wsz
        if cdt is not None:
            per_col += tm_k * jnp.dtype(cdt).itemsize
        tk = (max(budget - fixed, 0) // per_col) // 128 * 128
        tk = max(128, min(tk, 8192, _round_up(in_dim, 128)))

    kp = _round_up(in_dim, tk)
    if kp != in_dim:
        # One extra pad pass of x (cheap relative to this fallback regime)
        # keeps the OOB feature columns exactly zero instead of stale VMEM.
        x2 = jnp.pad(x2, ((0, 0), (0, kp - in_dim)))
        w1 = jnp.pad(w1, ((0, kp - in_dim), (0, 0)))

    num_m = pl.cdiv(n, tm_k)
    num_k = kp // tk
    cost = pl.CostEstimate(
        flops=flops,
        transcendentals=0,
        bytes_accessed=int(n * in_dim * itemsize + n * 4
                           + num_m * w1.size * wsz + weight_bytes),
    )
    return pl.pallas_call(
        _make_ktiled_kernel(cdt),
        out_shape=jax.ShapeDtypeStruct((n, 1), jnp.float32),
        grid_spec=pltpu.PrefetchScalarGridSpec(
            num_scalar_prefetch=0,
            grid=(num_m, num_k),
            in_specs=[
                pl.BlockSpec((tm_k, tk), lambda i, k: (i, k)),
                pl.BlockSpec((tk, hp), lambda i, k: (k, 0)),
                pl.BlockSpec((1, hp), lambda i, k: (0, 0)),
                pl.BlockSpec((hp, hp), lambda i, k: (0, 0)),
                pl.BlockSpec((1, hp), lambda i, k: (0, 0)),
                pl.BlockSpec((hp, 1), lambda i, k: (0, 0)),
                pl.BlockSpec((1, 1), lambda i, k: (0, 0)),
            ],
            out_specs=pl.BlockSpec((tm_k, 1), lambda i, k: (i, 0)),
            scratch_shapes=[pltpu.VMEM((tm_k, hp), jnp.float32)],
        ),
        compiler_params=pltpu.CompilerParams(
            dimension_semantics=("parallel", "arbitrary"),
            vmem_limit_bytes=vmem_limit),
        cost_estimate=cost,
    )(x2, w1, b1, w2, b2, w3, b3)


# --------------------------------------------------------------------------- #
# Params / reference
# --------------------------------------------------------------------------- #
def init_cscalar_params(key, in_dim, hidden_dim=10):
    """Deterministic init matching CScalar.__init__ layer shapes.
    Weights stored as (in_features, out_features); biases as (1, out_features)."""
    ks = jax.random.split(key, 6)

    def uinit(k, fan_in, shape):
        bound = 1.0 / jnp.sqrt(fan_in)  # PyTorch default Linear init range
        return jax.random.uniform(k, shape, jnp.float32, -bound, bound)

    w1 = uinit(ks[0], in_dim, (in_dim, hidden_dim))
    b1 = uinit(ks[1], in_dim, (1, hidden_dim))
    w2 = uinit(ks[2], hidden_dim, (hidden_dim, hidden_dim))
    b2 = uinit(ks[3], hidden_dim, (1, hidden_dim))
    w3 = uinit(ks[4], hidden_dim, (hidden_dim, 1))
    b3 = uinit(ks[5], hidden_dim, (1, 1))
    return (w1, b1, w2, b2, w3, b3)


def _reference_forward(x, params, in_dim):
    """Pure-JAX reference (unpadded params, f32)."""
    w1, b1, w2, b2, w3, b3 = params
    x2 = x.reshape(-1, in_dim).astype(jnp.float32)
    h1 = jnp.maximum(x2 @ w1 + b1, 0.0)
    h2 = jnp.maximum(h1 @ w2 + b2, 0.0)
    return h2 @ w3 + b3


if __name__ == "__main__":
    key = jax.random.PRNGKey(0)
    k_x, k_p = jax.random.split(key)

    # any input whose trailing dims flatten to in_dim; here (2, 4, 16, 16).
    in_dim = 4 * 16 * 16
    hidden_dim = 10
    x = jax.random.normal(k_x, (2, 4, 16, 16), dtype=jnp.float32)
    params = init_cscalar_params(k_p, in_dim, hidden_dim)
    ref = _reference_forward(x, params, in_dim)

    # 1) default single-pass path (exact f32)
    out = jax.block_until_ready(
        cscalar_forward(x, params, in_dim=in_dim, hidden_dim=hidden_dim))
    assert out.shape == (2, 1), out.shape
    assert jnp.allclose(out, ref, atol=1e-5, rtol=1e-5), "f32 path mismatch"

    # 2) multi-step grid with a partial last batch block (pins the OOB-row
    #    masking assumption on the write-back path)
    xb = jax.random.normal(k_x, (33, in_dim), dtype=jnp.float32)
    refb = _reference_forward(xb, params, in_dim)
    outb = jax.block_until_ready(
        cscalar_forward(xb, params, in_dim=in_dim, hidden_dim=hidden_dim, tm=8))
    assert outb.shape == (33, 1), outb.shape
    assert jnp.allclose(outb, refb, atol=1e-4, rtol=1e-4), "partial-block mismatch"

    # 3) K-tiled fallback path (forced; exercises the wide-in_dim robustness path
    #    including feature-axis zero padding: 1024 -> 3 chunks of 384)
    outk = jax.block_until_ready(
        cscalar_forward(xb, params, in_dim=in_dim, hidden_dim=hidden_dim,
                        tm=8, k_tile=384))
    assert outk.shape == (33, 1), outk.shape
    assert jnp.allclose(outk, refb, atol=1e-4, rtol=1e-4), "K-tiled mismatch"

    # 4) optional bf16-compute lever (v5e / v7x); loose tolerance by design
    outh = jax.block_until_ready(
        cscalar_forward(x, params, in_dim=in_dim, hidden_dim=hidden_dim,
                        compute_dtype="bfloat16"))
    assert outh.shape == (2, 1), outh.shape
    assert jnp.allclose(outh, ref, atol=1e-1, rtol=1e-1), "bf16 path mismatch"

    print("KERNEL_OK")
</pallas_src>

<mosaic_0001>
module attributes {stable_mosaic.version = 11 : i64} {
  func.func @kernel(%arg0: i32, %arg1: memref<8x1024xf32, #tpu.memory_space<vmem>>, %arg2: memref<1024x128xf32, #tpu.memory_space<vmem>>, %arg3: memref<1x128xf32, #tpu.memory_space<vmem>>, %arg4: memref<128x128xf32, #tpu.memory_space<vmem>>, %arg5: memref<1x128xf32, #tpu.memory_space<vmem>>, %arg6: memref<128x1xf32, #tpu.memory_space<vmem>>, %arg7: memref<1x1xf32, #tpu.memory_space<vmem>>, %arg8: memref<8x1xf32, #tpu.memory_space<vmem>>) attributes {dimension_semantics = [#tpu.dimension_semantics<parallel>], iteration_bounds = array<i64: 1>, scalar_prefetch = 0 : i64, scratch_operands = 0 : i64, tpu.core_type = #tpu.core_type<tc>, window_params = [{transform_indices = @transform_0, window_bounds = array<i64: 8, 1024>}, {pipeline_mode = #tpu.pipeline_mode<synchronous>, transform_indices = @transform_1, window_bounds = array<i64: 1024, 128>}, {pipeline_mode = #tpu.pipeline_mode<synchronous>, transform_indices = @transform_2, window_bounds = array<i64: 1, 128>}, {pipeline_mode = #tpu.pipeline_mode<synchronous>, transform_indices = @transform_3, window_bounds = array<i64: 128, 128>}, {pipeline_mode = #tpu.pipeline_mode<synchronous>, transform_indices = @transform_4, window_bounds = array<i64: 1, 128>}, {pipeline_mode = #tpu.pipeline_mode<synchronous>, transform_indices = @transform_5, window_bounds = array<i64: 128, 1>}, {pipeline_mode = #tpu.pipeline_mode<synchronous>, transform_indices = @transform_6, window_bounds = array<i64: 1, 1>}, {transform_indices = @transform_7, window_bounds = array<i64: 8, 1>}]} {
    %c0 = arith.constant 0 : index
    %c0_0 = arith.constant 0 : index
    %0 = vector.load %arg1[%c0, %c0_0] : memref<8x1024xf32, #tpu.memory_space<vmem>>, vector<8x1024xf32>
    %c0_1 = arith.constant 0 : index
    %c0_2 = arith.constant 0 : index
    %1 = vector.load %arg2[%c0_1, %c0_2] : memref<1024x128xf32, #tpu.memory_space<vmem>>, vector<1024x128xf32>
    %c0_3 = arith.constant 0 : index
    %c0_4 = arith.constant 0 : index
    %2 = vector.load %arg4[%c0_3, %c0_4] : memref<128x128xf32, #tpu.memory_space<vmem>>, vector<128x128xf32>
    %c0_5 = arith.constant 0 : index
    %c0_6 = arith.constant 0 : index
    %3 = vector.load %arg6[%c0_5, %c0_6] : memref<128x1xf32, #tpu.memory_space<vmem>>, vector<128x1xf32>
    %cst = arith.constant dense<0.000000e+00> : vector<8x128xf32>
    %4 = tpu.matmul %0, %1, %cst {dimension_numbers = #tpu.dot_dimension_numbers<[1], [0], [0], [1], [0, 0, 1, 1], [], []>} : vector<8x1024xf32>, vector<1024x128xf32>, vector<8x128xf32> -> vector<8x128xf32>
    %c0_7 = arith.constant 0 : index
    %c0_8 = arith.constant 0 : index
    %5 = vector.load %arg3[%c0_7, %c0_8] : memref<1x128xf32, #tpu.memory_space<vmem>>, vector<1x128xf32>
    %6 = vector.broadcast %5 : vector<1x128xf32> to vector<8x128xf32>
    %7 = arith.addf %4, %6 : vector<8x128xf32>
    %cst_9 = arith.constant 0.000000e+00 : f32
    %8 = vector.broadcast %cst_9 : f32 to vector<8x128xf32>
    %9 = arith.maximumf %7, %8 : vector<8x128xf32>
    %cst_10 = arith.constant dense<0.000000e+00> : vector<8x128xf32>
    %10 = tpu.matmul %9, %2, %cst_10 {dimension_numbers = #tpu.dot_dimension_numbers<[1], [0], [0], [1], [0, 0, 1, 1], [], []>} : vector<8x128xf32>, vector<128x128xf32>, vector<8x128xf32> -> vector<8x128xf32>
    %c0_11 = arith.constant 0 : index
    %c0_12 = arith.constant 0 : index
    %11 = vector.load %arg5[%c0_11, %c0_12] : memref<1x128xf32, #tpu.memory_space<vmem>>, vector<1x128xf32>
    %12 = vector.broadcast %11 : vector<1x128xf32> to vector<8x128xf32>
    %13 = arith.addf %10, %12 : vector<8x128xf32>
    %cst_13 = arith.constant 0.000000e+00 : f32
    %14 = vector.broadcast %cst_13 : f32 to vector<8x128xf32>
    %15 = arith.maximumf %13, %14 : vector<8x128xf32>
    %cst_14 = arith.constant dense<0.000000e+00> : vector<8x1xf32>
    %16 = tpu.matmul %15, %3, %cst_14 {dimension_numbers = #tpu.dot_dimension_numbers<[1], [0], [0], [1], [0, 0, 1, 1], [], []>} : vector<8x128xf32>, vector<128x1xf32>, vector<8x1xf32> -> vector<8x1xf32>
    %c0_15 = arith.constant 0 : index
    %c0_16 = arith.constant 0 : index
    %17 = vector.load %arg7[%c0_15, %c0_16] : memref<1x1xf32, #tpu.memory_space<vmem>>, vector<1x1xf32>
    %18 = vector.broadcast %17 : vector<1x1xf32> to vector<8x1xf32>
    %19 = arith.addf %16, %18 : vector<8x1xf32>
    %c0_17 = arith.constant 0 : index
    %c0_18 = arith.constant 0 : index
    %20 = vector.load %arg8[%c0_17, %c0_18] : memref<8x1xf32, #tpu.memory_space<vmem>>, vector<8x1xf32>
    tpu.vector_store %arg8[%c0_17, %c0_18], %19 {strides = array<i32>} : memref<8x1xf32, #tpu.memory_space<vmem>>, vector<8x1xf32>,
    return
  }
  func.func @transform_0(%arg0: i32) -> (i32, i32) {
    %c0_i32 = arith.constant 0 : i32
    %c0_i32_0 = arith.constant 0 : i32
    return %arg0, %c0_i32 : i32, i32
  }
  func.func @transform_1(%arg0: i32) -> (i32, i32) {
    %c0_i32 = arith.constant 0 : i32
    %c0_i32_0 = arith.constant 0 : i32
    %c0_i32_1 = arith.constant 0 : i32
    return %c0_i32, %c0_i32_0 : i32, i32
  }
  func.func @transform_2(%arg0: i32) -> (i32, i32) {
    %c0_i32 = arith.constant 0 : i32
    %c0_i32_0 = arith.constant 0 : i32
    %c0_i32_1 = arith.constant 0 : i32
    return %c0_i32, %c0_i32_0 : i32, i32
  }
  func.func @transform_3(%arg0: i32) -> (i32, i32) {
    %c0_i32 = arith.constant 0 : i32
    %c0_i32_0 = arith.constant 0 : i32
    %c0_i32_1 = arith.constant 0 : i32
    return %c0_i32, %c0_i32_0 : i32, i32
  }
  func.func @transform_4(%arg0: i32) -> (i32, i32) {
    %c0_i32 = arith.constant 0 : i32
    %c0_i32_0 = arith.constant 0 : i32
    %c0_i32_1 = arith.constant 0 : i32
    return %c0_i32, %c0_i32_0 : i32, i32
  }
  func.func @transform_5(%arg0: i32) -> (i32, i32) {
    %c0_i32 = arith.constant 0 : i32
    %c0_i32_0 = arith.constant 0 : i32
    %c0_i32_1 = arith.constant 0 : i32
    return %c0_i32, %c0_i32_0 : i32, i32
  }
  func.func @transform_6(%arg0: i32) -> (i32, i32) {
    %c0_i32 = arith.constant 0 : i32
    %c0_i32_0 = arith.constant 0 : i32
    %c0_i32_1 = arith.constant 0 : i32
    return %c0_i32, %c0_i32_0 : i32, i32
  }
  func.func @transform_7(%arg0: i32) -> (i32, i32) {
    %c0_i32 = arith.constant 0 : i32
    %c0_i32_0 = arith.constant 0 : i32
    return %arg0, %c0_i32 : i32, i32
  }
}

</mosaic_0001>

<bundles_post_ra>
// kernel: cscalar_forward.1
= control target key start
LH: loop header
LB: loop body
LE: loop exit
PB: predicated region body
PF: predicated region fallthrough
CT: control target
= control target key end

     0   :  { %s1793_s0 = inlined_call_operand.vmem [shape: f32[2,1024], index: 0, kind: input, shape index: {}]   ;;  %s1794_s1 = inlined_call_operand.vmem [shape: f32[1024,128], index: 1, kind: input, shape index: {}]   ;;  %s1795_s2 = inlined_call_operand.vmem [shape: f32[1,128], index: 2, kind: input, shape index: {}]   ;;  %s1796_s3 = inlined_call_operand.vmem [shape: f32[128,128], index: 3, kind: input, shape index: {}]   ;;  %s1797_s4 = inlined_call_operand.vmem [shape: f32[1,128], index: 4, kind: input, shape index: {}]   ;;  %s1798_s5 = inlined_call_operand.vmem [shape: f32[128,1], index: 5, kind: input, shape index: {}]   ;;  %s1799_s6 = inlined_call_operand.<no memory space> [shape: f32[1,1], index: 6, kind: input, shape index: {}]   ;;  %s1800_s7 = inlined_call_operand.vmem [shape: f32[2,1], index: 7, kind: output, shape index: {}]  }
   0x1   :  { %v12_v0 = vstv %s1799_s6 }
   0x2   :  { %13 = vst [vmem:[#allocation2] sm:$0x1] %v12_v0 }
   0x3   :  { %v52_v1 = vld [vmem:[%s1794_s1 + $0x80] sm:$0xff]  ;;  %v53_v2 = vld [vmem:[%s1794_s1 + $0x88] sm:$0xff]  ;;  %v54_v12 = vld [vmem:[%s1794_s1 + $0x90] sm:$0xff]  ;;  %v1207_v52 = vmov 1983009808   ;;  %v218_v54 = vlaneseq  ;;  %vm1209_vm0 = vmmov 0  }
   0x4   :  { %v36_v3 = vld [vmem:[%s1794_s1] sm:$0xff]  ;;  %v1015_v4 = vpack.c.bf16 %v53_v2, %v52_v1  ;;  %v37_v5 = vld [vmem:[%s1794_s1 + $0x8] sm:$0xff]  ;;  %v55_v14 = vld [vmem:[%s1794_s1 + $0x98] sm:$0xff]  ;;  %v216_v53 = vunpack.c.l.s4 %v1207_v52  ;;  %vm727_vm1 = vcmask 7168  }
   0x5   :  { %v84_v6 = vld [vmem:[%s1794_s1 + $0x180] sm:$0xff]  ;;  %v85_v7 = vld [vmem:[%s1794_s1 + $0x188] sm:$0xff]  ;;  %v1017_v8 = vpack.c.bf16 %v37_v5, %v36_v3  ;;  %v38_v15 = vld [vmem:[%s1794_s1 + $0x10] sm:$0xff]  ;;  %v1019_v17 = vpack.c.bf16 %v55_v14, %v54_v12 }
   0x6   :  { %v1047_v9 = vpack.c.bf16 %v85_v7, %v84_v6  ;;  %v68_v10 = vld [vmem:[%s1794_s1 + $0x100] sm:$0xff]  ;;  %v69_v11 = vld [vmem:[%s1794_s1 + $0x108] sm:$0xff]  ;;  %1016 = vmatprep.subr.bf16.mxu0 %v1015_v4  ;;  %v39_v16 = vld [vmem:[%s1794_s1 + $0x18] sm:$0xff]  ;;  %v217_v3 = vunpack.c.0.s8 %v216_v53  ;;  %v219_v4 = vshrl.u32 %v218_v54, 7 }
   0x7   :  { %v1049_v13 = vpack.c.bf16 %v69_v11, %v68_v10  ;;  %1018 = vmatpush3.bf16.msra.mxu0 %v1017_v8  ;;  %v1021_v18 = vpack.c.bf16 %v39_v16, %v38_v15  ;;  %v86_v19 = vld [vmem:[%s1794_s1 + $0x190] sm:$0xff]  ;;  %v87_v20 = vld [vmem:[%s1794_s1 + $0x198] sm:$0xff]  ;;  %v56_v24 = vld [vmem:[%s1794_s1 + $0xa0] sm:$0xff] }
   0x8   :  { %1048 = vmatprep.subr.bf16.mxu1 %v1047_v9  ;;  %v70_v21 = vld [vmem:[%s1794_s1 + $0x110] sm:$0xff]  ;;  %v1051_v22 = vpack.c.bf16 %v87_v20, %v86_v19  ;;  %v71_v23 = vld [vmem:[%s1794_s1 + $0x118] sm:$0xff]  ;;  %v57_v25 = vld [vmem:[%s1794_s1 + $0xa8] sm:$0xff]  ;;  %1020 = vmatprep.subr.bf16.mxu0 %v1019_v17 }
   0x9   :  { %1050 = vmatpush3.bf16.msra.mxu1 %v1049_v13  ;;  %v1053_v26 = vpack.c.bf16 %v71_v23, %v70_v21  ;;  %v1023_v27 = vpack.c.bf16 %v57_v25, %v56_v24  ;;  %v40_v28 = vld [vmem:[%s1794_s1 + $0x20] sm:$0xff]  ;;  %v41_v29 = vld [vmem:[%s1794_s1 + $0x28] sm:$0xff]  ;;  %v58_v36 = vld [vmem:[%s1794_s1 + $0xb0] sm:$0xff] }
   0xa   :  { %v88_v30 = vld [vmem:[%s1794_s1 + $0x1a0] sm:$0xff]  ;;  %1052 = vmatprep.subr.bf16.mxu1 %v1051_v22  ;;  %v89_v31 = vld [vmem:[%s1794_s1 + $0x1a8] sm:$0xff]  ;;  %v1025_v34 = vpack.c.bf16 %v41_v29, %v40_v28  ;;  %v59_v37 = vld [vmem:[%s1794_s1 + $0xb8] sm:$0xff]  ;;  %v1425_v22 = vsub.s32 %v217_v3, %v219_v4 }
   0xb   :  { %v72_v32 = vld [vmem:[%s1794_s1 + $0x120] sm:$0xff]  ;;  %v73_v33 = vld [vmem:[%s1794_s1 + $0x128] sm:$0xff]  ;;  %1022 = vmatpush3.bf16.msra.mxu0 %v1021_v18  ;;  %v1055_v35 = vpack.c.bf16 %v89_v31, %v88_v30  ;;  %v42_v38 = vld [vmem:[%s1794_s1 + $0x30] sm:$0xff]  ;;  %v1027_v40 = vpack.c.bf16 %v59_v37, %v58_v36 }
   0xc   :  { %1024 = vmatprep.subr.bf16.mxu0 %v1023_v27  ;;  %v1057_v39 = vpack.c.bf16 %v73_v33, %v72_v32  ;;  %v43_v41 = vld [vmem:[%s1794_s1 + $0x38] sm:$0xff]  ;;  %v90_v42 = vld [vmem:[%s1794_s1 + $0x1b0] sm:$0xff]  ;;  %v60_v47 = vld [vmem:[%s1794_s1 + $0xc0] sm:$0xff] }
   0xd   :  { %1054 = vmatpush3.bf16.msra.mxu1 %v1053_v26  ;;  %v91_v43 = vld [vmem:[%s1794_s1 + $0x1b8] sm:$0xff]  ;;  %v74_v45 = vld [vmem:[%s1794_s1 + $0x130] sm:$0xff]  ;;  %v61_v48 = vld [vmem:[%s1794_s1 + $0xc8] sm:$0xff]  ;;  %v1029_v49 = vpack.c.bf16 %v43_v41, %v42_v38 }
   0xe   :  { %1056 = vmatprep.subr.bf16.mxu1 %v1055_v35  ;;  %v1059_v44 = vpack.c.bf16 %v91_v43, %v90_v42  ;;  %v75_v46 = vld [vmem:[%s1794_s1 + $0x138] sm:$0xff]  ;;  %v92_v50 = vld [vmem:[%s1794_s1 + $0x1c0] sm:$0xff]  ;;  %v93_v51 = vld [vmem:[%s1794_s1 + $0x1c8] sm:$0xff]  ;;  %v1031_v56 = vpack.c.bf16 %v61_v48, %v60_v47 }
   0xf   :  { %1026 = vmatpush3.bf16.msra.mxu0 %v1025_v34  ;;  %v1061_v55 = vpack.c.bf16 %v75_v46, %v74_v45  ;;  %v44_v57 = vld [vmem:[%s1794_s1 + $0x40] sm:$0xff]  ;;  %v45_v58 = vld [vmem:[%s1794_s1 + $0x48] sm:$0xff]  ;;  %v1063_v60 = vpack.c.bf16 %v93_v51, %v92_v50  ;;  %v62_v62 = vld [vmem:[%s1794_s1 + $0xd0] sm:$0xff] }
  0x10   :  { %1028 = vmatprep.subr.bf16.mxu0 %v1027_v40  ;;  %v76_v59 = vld [vmem:[%s1794_s1 + $0x140] sm:$0xff]  ;;  %v77_v61 = vld [vmem:[%s1794_s1 + $0x148] sm:$0xff]  ;;  %v63_v63 = vld [vmem:[%s1794_s1 + $0xd8] sm:$0xff]  ;;  %v1033_v2 = vpack.c.bf16 %v45_v58, %v44_v57 }
  0x11   :  { %1058 = vmatpush3.bf16.msra.mxu1 %v1057_v39  ;;  %v94_v0 = vld [vmem:[%s1794_s1 + $0x1d0] sm:$0xff]  ;;  %v95_v1 = vld [vmem:[%s1794_s1 + $0x1d8] sm:$0xff]  ;;  %v1065_v5 = vpack.c.bf16 %v77_v61, %v76_v59  ;;  %v1035_v6 = vpack.c.bf16 %v63_v63, %v62_v62  ;;  %v64_v12 = vld [vmem:[%s1794_s1 + $0xe0] sm:$0xff] }
  0x12   :  { %1060 = vmatprep.subr.bf16.mxu1 %v1059_v44  ;;  %v46_v7 = vld [vmem:[%s1794_s1 + $0x50] sm:$0xff]  ;;  %v47_v8 = vld [vmem:[%s1794_s1 + $0x58] sm:$0xff]  ;;  %v1067_v10 = vpack.c.bf16 %v95_v1, %v94_v0  ;;  %v65_v13 = vld [vmem:[%s1794_s1 + $0xe8] sm:$0xff] }
  0x13   :  { %1030 = vmatpush3.bf16.msra.mxu0 %v1029_v49  ;;  %v78_v9 = vld [vmem:[%s1794_s1 + $0x150] sm:$0xff]  ;;  %v79_v11 = vld [vmem:[%s1794_s1 + $0x158] sm:$0xff]  ;;  %v48_v14 = vld [vmem:[%s1794_s1 + $0x60] sm:$0xff]  ;;  %v1037_v18 = vpack.c.bf16 %v47_v8, %v46_v7  ;;  %v1039_v24 = vpack.c.bf16 %v65_v13, %v64_v12 }
  0x14   :  { %1032 = vmatprep.subr.bf16.mxu0 %v1031_v56  ;;  %v49_v15 = vld [vmem:[%s1794_s1 + $0x68] sm:$0xff]  ;;  %v96_v16 = vld [vmem:[%s1794_s1 + $0x1e0] sm:$0xff]  ;;  %v66_v21 = vld [vmem:[%s1794_s1 + $0xf0] sm:$0xff]  ;;  %v1069_v23 = vpack.c.bf16 %v79_v11, %v78_v9 }
  0x15   :  { %1062 = vmatpush3.bf16.msra.mxu1 %v1061_v55  ;;  %v97_v17 = vld [vmem:[%s1794_s1 + $0x1e8] sm:$0xff]  ;;  %v80_v19 = vld [vmem:[%s1794_s1 + $0x160] sm:$0xff]  ;;  %v67_v25 = vld [vmem:[%s1794_s1 + $0xf8] sm:$0xff]  ;;  %v1041_v31 = vpack.c.bf16 %v49_v15, %v48_v14 }
  0x16   :  { %1064 = vmatprep.subr.bf16.mxu1 %v1063_v60  ;;  %v81_v20 = vld [vmem:[%s1794_s1 + $0x168] sm:$0xff]  ;;  %v1071_v26 = vpack.c.bf16 %v97_v17, %v96_v16  ;;  %v1195_v27 = vld [vmem:[%s1793_s0] ss:$16 sps:$4 sm:$0xff]   ;;  %v99_v29 = vld [vmem:[%s1794_s1 + $0x1f8] sm:$0xff]  ;;  %v1043_v36 = vpack.c.bf16 %v67_v25, %v66_v21 }
  0x17   :  { %1034 = vmatpush3.bf16.msra.mxu0 %v1033_v2  ;;  %v98_v28 = vld [vmem:[%s1794_s1 + $0x1f0] sm:$0xff]  ;;  %v221_v32 = vrot.slane %v1195_v27, %v1425_v22  ;;  %v1073_v35 = vpack.c.bf16 %v81_v20, %v80_v19  ;;  %v51_v38 = vld [vmem:[%s1794_s1 + $0x78] sm:$0xff]  ;;  %v116_v43 = vld [vmem:[%s1794_s1 + $0x280] sm:$0xff] }
  0x18   :  { %1036 = vmatprep.subr.bf16.mxu0 %v1035_v6  ;;  %v1197_v30 = vld [vmem:[%s1793_s0 + $0x20] ss:$16 sps:$4 sm:$0xff]   ;;  %v1199_v33 = vld [vmem:[%s1793_s0 + $0x4] ss:$16 sps:$4 sm:$0xff]   ;;  %v1075_v41 = vpack.c.bf16 %v99_v29, %v98_v28  ;;  %v83_v42 = vld [vmem:[%s1794_s1 + $0x178] sm:$0xff] }
  0x19   :  { %1066 = vmatpush3.bf16.msra.mxu1 %v1065_v5  ;;  %v1200_v34 = vld [vmem:[%s1793_s0 + $0x24] ss:$16 sps:$4 sm:$0xff]   ;;  %v235_v40 = vrot.slane %v1197_v30, %v1425_v22  ;;  %v117_v44 = vld [vmem:[%s1794_s1 + $0x288] sm:$0xff]  ;;  %v228_v45 = vrot.slane %v1199_v33, %v1425_v22  ;;  %v119_v60 = vld [vmem:[%s1794_s1 + $0x298] sm:$0xff] }
  0x1a   :  { %1068 = vmatprep.subr.bf16.mxu1 %v1067_v10  ;;  %v50_v37 = vld [vmem:[%s1794_s1 + $0x70] sm:$0xff]  ;;  %v242_v46 = vrot.slane %v1200_v34, %v1425_v22  ;;  %v148_v48 = vld [vmem:[%s1794_s1 + $0x380] sm:$0xff]  ;;  %v149_v49 = vld [vmem:[%s1794_s1 + $0x388] sm:$0xff]  ;;  %v1079_v53 = vpack.c.bf16 %v117_v44, %v116_v43 }
  0x1b   :  { %1038 = vmatpush3.bf16.msra.mxu0 %v1037_v18  ;;  %v82_v39 = vld [vmem:[%s1794_s1 + $0x170] sm:$0xff]  ;;  %v244_v47 = vcombine.high %v221_v32, %v235_v40  ;;  %v1045_v50 = vpack.c.bf16 %v51_v38, %v50_v37  ;;  %v100_v54 = vld [vmem:[%s1794_s1 + $0x200] sm:$0xff]  ;;  %v101_v55 = vld [vmem:[%s1794_s1 + $0x208] sm:$0xff]  ;;  %v1111_v57 = vpack.c.bf16 %v149_v49, %v148_v48  ;;  %v243_v61 = vcombine.low %v221_v32, %v235_v40 }
  0x1c   :  { %1040 = vmatprep.subr.bf16.mxu0 %v1039_v24  ;;  %v246_v51 = vcombine.high %v228_v45, %v242_v46  ;;  %v1077_v52 = vpack.c.bf16 %v83_v42, %v82_v39  ;;  %v132_v56 = vld [vmem:[%s1794_s1 + $0x300] sm:$0xff]  ;;  %v133_v58 = vld [vmem:[%s1794_s1 + $0x308] sm:$0xff]  ;;  %v118_v59 = vld [vmem:[%s1794_s1 + $0x290] sm:$0xff]  ;;  %v1081_v0 = vpack.c.bf16 %v101_v55, %v100_v54  ;;  %v245_v1 = vcombine.low %v228_v45, %v242_v46 }
  0x1d   :  { %1070 = vmatpush3.bf16.msra.mxu1 %v1069_v23  ;;  %355 = vmatprep.mubr.f32.mxu0 %v244_v47  ;;  %v150_v62 = vld [vmem:[%s1794_s1 + $0x390] sm:$0xff]  ;;  %v151_v63 = vld [vmem:[%s1794_s1 + $0x398] sm:$0xff]  ;;  %v1113_v2 = vpack.c.bf16 %v133_v58, %v132_v56  ;;  %v1083_v3 = vpack.c.bf16 %v119_v60, %v118_v59  ;;  %v120_v9 = vld [vmem:[%s1794_s1 + $0x2a0] sm:$0xff] }
  0x1e   :  { %1072 = vmatprep.subr.bf16.mxu1 %v1071_v26  ;;  %425 = vmatprep.mubr.f32.mxu1 %v246_v51  ;;  %v102_v4 = vld [vmem:[%s1794_s1 + $0x210] sm:$0xff]  ;;  %v103_v5 = vld [vmem:[%s1794_s1 + $0x218] sm:$0xff]  ;;  %v1115_v7 = vpack.c.bf16 %v151_v63, %v150_v62  ;;  %v121_v10 = vld [vmem:[%s1794_s1 + $0x2a8] sm:$0xff] }
  0x1f   :  { %1042 = vmatpush3.bf16.msra.mxu0 %v1041_v31  ;;  %v134_v6 = vld [vmem:[%s1794_s1 + $0x310] sm:$0xff]  ;;  %v135_v8 = vld [vmem:[%s1794_s1 + $0x318] sm:$0xff]  ;;  %v152_v11 = vld [vmem:[%s1794_s1 + $0x3a0] sm:$0xff]  ;;  %v1085_v13 = vpack.c.bf16 %v103_v5, %v102_v4  ;;  %v1087_v15 = vpack.c.bf16 %v121_v10, %v120_v9 }
  0x20   :  { %1044 = vmatprep.subr.bf16.mxu0 %v1043_v36  ;;  %v153_v12 = vld [vmem:[%s1794_s1 + $0x3a8] sm:$0xff]  ;;  %v1117_v14 = vpack.c.bf16 %v135_v8, %v134_v6  ;;  %v104_v16 = vld [vmem:[%s1794_s1 + $0x220] sm:$0xff]  ;;  %v122_v21 = vld [vmem:[%s1794_s1 + $0x2b0] sm:$0xff] }
  0x21   :  { %1074 = vmatpush3.bf16.msra.mxu1 %v1073_v35  ;;  %v105_v17 = vld [vmem:[%s1794_s1 + $0x228] sm:$0xff]  ;;  %v136_v18 = vld [vmem:[%s1794_s1 + $0x320] sm:$0xff]  ;;  %v1119_v19 = vpack.c.bf16 %v153_v12, %v152_v11  ;;  %v123_v23 = vld [vmem:[%s1794_s1 + $0x2b8] sm:$0xff] }
  0x22   :  { %1076 = vmatprep.subr.bf16.mxu1 %v1075_v41  ;;  %v137_v20 = vld [vmem:[%s1794_s1 + $0x328] sm:$0xff]  ;;  %v154_v24 = vld [vmem:[%s1794_s1 + $0x3b0] sm:$0xff]  ;;  %v155_v25 = vld [vmem:[%s1794_s1 + $0x3b8] sm:$0xff]  ;;  %v1089_v26 = vpack.c.bf16 %v105_v17, %v104_v16  ;;  %v1091_v28 = vpack.c.bf16 %v123_v23, %v122_v21 }
  0x23   :  { %1046 = vmatpush3.bf16.msra.mxu0 %v1045_v50  ;;  %v1121_v27 = vpack.c.bf16 %v137_v20, %v136_v18  ;;  %v106_v29 = vld [vmem:[%s1794_s1 + $0x230] sm:$0xff]  ;;  %v107_v30 = vld [vmem:[%s1794_s1 + $0x238] sm:$0xff]  ;;  %v1123_v32 = vpack.c.bf16 %v155_v25, %v154_v24  ;;  %v124_v34 = vld [vmem:[%s1794_s1 + $0x2c0] sm:$0xff] }
  0x24   :  { %1080 = vmatprep.subr.bf16.mxu0 %v1079_v53  ;;  %v138_v31 = vld [vmem:[%s1794_s1 + $0x330] sm:$0xff]  ;;  %v139_v33 = vld [vmem:[%s1794_s1 + $0x338] sm:$0xff]  ;;  %v125_v35 = vld [vmem:[%s1794_s1 + $0x2c8] sm:$0xff]  ;;  %v1093_v41 = vpack.c.bf16 %v107_v30, %v106_v29 }
  0x25   :  { %1078 = vmatpush3.bf16.msra.mxu1 %v1077_v52  ;;  %v108_v36 = vld [vmem:[%s1794_s1 + $0x240] sm:$0xff]  ;;  %v109_v37 = vld [vmem:[%s1794_s1 + $0x248] sm:$0xff]  ;;  %v126_v43 = vld [vmem:[%s1794_s1 + $0x2d0] sm:$0xff]  ;;  %v1125_v45 = vpack.c.bf16 %v139_v33, %v138_v31  ;;  %v1095_v46 = vpack.c.bf16 %v125_v35, %v124_v34  ;;  %v1208_v35 = vmov 0.0|0.0  }
  0x26   :  { %1112 = vmatprep.subr.bf16.mxu1 %v1111_v57  ;;  %356 = vmatmul.mubr.f32.vlgmr.msra.gmra.mrb[0].mxu0 %v243_v61  ;;  %v156_v38 = vld [vmem:[%s1794_s1 + $0x3c0] sm:$0xff]  ;;  %v157_v39 = vld [vmem:[%s1794_s1 + $0x3c8] sm:$0xff]  ;;  %v127_v44 = vld [vmem:[%s1794_s1 + $0x2d8] sm:$0xff]  ;;  %v1097_v54 = vpack.c.bf16 %v109_v37, %v108_v36 }
  0x27   :  { %1082 = vmatpush3.bf16.msra.mxu0 %v1081_v0  ;;  %v140_v40 = vld [vmem:[%s1794_s1 + $0x340] sm:$0xff]  ;;  %v141_v42 = vld [vmem:[%s1794_s1 + $0x348] sm:$0xff]  ;;  %v158_v47 = vld [vmem:[%s1794_s1 + $0x3d0] sm:$0xff]  ;;  %v1127_v49 = vpack.c.bf16 %v157_v39, %v156_v38  ;;  %v1099_v56 = vpack.c.bf16 %v127_v44, %v126_v43 }
  0x28   :  { %426 = vmatmul.mubr.f32.vlgmr.msra.gmra.mrb[0].mxu1 %v245_v1  ;;  %1084 = vmatprep.subr.bf16.mxu0 %v1083_v3  ;;  %v159_v48 = vld [vmem:[%s1794_s1 + $0x3d8] sm:$0xff]  ;;  %v1129_v55 = vpack.c.bf16 %v141_v42, %v140_v40  ;;  %v110_v58 = vld [vmem:[%s1794_s1 + $0x250] sm:$0xff]  ;;  %v129_v3 = vld [vmem:[%s1794_s1 + $0x2e8] sm:$0xff] }
  0x29   :  { %1114 = vmatpush3.bf16.msra.mxu1 %v1113_v2  ;;  %v1201_v50 = vld [vmem:[%s1793_s0 + $0x8] ss:$16 sps:$4 sm:$0xff]   ;;  %v1205_v52 = vld [vmem:[%s1793_s0 + $0xc] ss:$16 sps:$4 sm:$0xff]   ;;  %v142_v60 = vld [vmem:[%s1794_s1 + $0x350] sm:$0xff]  ;;  %v1131_v0 = vpack.c.bf16 %v159_v48, %v158_v47 }
  0x2a   :  { %1116 = vmatprep.subr.bf16.mxu1 %v1115_v7  ;;  %v1203_v51 = vld [vmem:[%s1793_s0 + $0x28] ss:$16 sps:$4 sm:$0xff]   ;;  %v1206_v53 = vld [vmem:[%s1793_s0 + $0x2c] ss:$16 sps:$4 sm:$0xff]   ;;  %v257_v57 = vrot.slane %v1201_v50, %v1425_v22  ;;  %v264_v62 = vrot.slane %v1205_v52, %v1425_v22  ;;  %v128_v2 = vld [vmem:[%s1794_s1 + $0x2e0] sm:$0xff] }
  0x2b   :  { %1086 = vmatpush3.bf16.msra.mxu0 %v1085_v13  ;;  %v111_v59 = vld [vmem:[%s1794_s1 + $0x258] sm:$0xff]  ;;  %v271_v61 = vrot.slane %v1203_v51, %v1425_v22  ;;  %v278_v63 = vrot.slane %v1206_v53, %v1425_v22  ;;  %v160_v4 = vld [vmem:[%s1794_s1 + $0x3e0] sm:$0xff]  ;;  %v161_v22 = vld [vmem:[%s1794_s1 + $0x3e8] sm:$0xff]  ;;  %v1103_v9 = vpack.c.bf16 %v129_v3, %v128_v2 }
  0x2c   :  { %1088 = vmatprep.subr.bf16.mxu0 %v1087_v15  ;;  %v143_v1 = vld [vmem:[%s1794_s1 + $0x358] sm:$0xff]  ;;  %v1101_v7 = vpack.c.bf16 %v111_v59, %v110_v58  ;;  %v112_v10 = vld [vmem:[%s1794_s1 + $0x260] sm:$0xff]  ;;  %v113_v11 = vld [vmem:[%s1794_s1 + $0x268] sm:$0xff]  ;;  %v1135_v13 = vpack.c.bf16 %v161_v22, %v160_v4 }
  0x2d   :  { %1118 = vmatpush3.bf16.msra.mxu1 %v1117_v14  ;;  %v280_v5 = vcombine.high %v257_v57, %v271_v61  ;;  %v282_v6 = vcombine.high %v264_v62, %v278_v63  ;;  %v1133_v8 = vpack.c.bf16 %v143_v1, %v142_v60  ;;  %v144_v12 = vld [vmem:[%s1794_s1 + $0x360] sm:$0xff]  ;;  %v145_v14 = vld [vmem:[%s1794_s1 + $0x368] sm:$0xff]  ;;  %v130_v15 = vld [vmem:[%s1794_s1 + $0x2f0] sm:$0xff]  ;;  %v279_v30 = vcombine.low %v257_v57, %v271_v61 }
  0x2e   :  { %1120 = vmatprep.subr.bf16.mxu1 %v1119_v19  ;;  %v131_v16 = vld [vmem:[%s1794_s1 + $0x2f8] sm:$0xff]  ;;  %v162_v17 = vld [vmem:[%s1794_s1 + $0x3f0] sm:$0xff]  ;;  %v1105_v19 = vpack.c.bf16 %v113_v11, %v112_v10  ;;  %v1137_v20 = vpack.c.bf16 %v145_v14, %v144_v12  ;;  %v281_v31 = vcombine.low %v264_v62, %v278_v63  ;;  %v165_v33 = vld [vmem:[%s1796_s3 + $0x8] sm:$0xff]  ;;  %v1210_v57 = vmov 0.0  }
  0x2f   :  { %1090 = vmatpush3.bf16.msra.mxu0 %v1089_v26  ;;  %495 = vmatprep.mubr.f32.mxu0 %v280_v5  ;;  %v163_v18 = vld [vmem:[%s1794_s1 + $0x3f8] sm:$0xff]  ;;  %v1107_v21 = vpack.c.bf16 %v131_v16, %v130_v15  ;;  %v114_v23 = vld [vmem:[%s1794_s1 + $0x270] sm:$0xff]  ;;  %v168_v39 = vld [vmem:[%s1796_s3 + $0x20] sm:$0xff] }
  0x30   :  { %1092 = vmatprep.subr.bf16.mxu0 %v1091_v28  ;;  %565 = vmatprep.mubr.f32.mxu1 %v282_v6  ;;  %v115_v24 = vld [vmem:[%s1794_s1 + $0x278] sm:$0xff]  ;;  %v1139_v25 = vpack.c.bf16 %v163_v18, %v162_v17  ;;  %v146_v26 = vld [vmem:[%s1794_s1 + $0x370] sm:$0xff]  ;;  %v169_v40 = vld [vmem:[%s1796_s3 + $0x28] sm:$0xff] }
  0x31   :  { %1122 = vmatpush3.bf16.msra.mxu1 %v1121_v27  ;;  %v147_v27 = vld [vmem:[%s1794_s1 + $0x378] sm:$0xff]  ;;  %v1109_v28 = vpack.c.bf16 %v115_v24, %v114_v23  ;;  %v166_v34 = vld [vmem:[%s1796_s3 + $0x10] sm:$0xff]  ;;  %v176_v51 = vld [vmem:[%s1796_s3 + $0x60] sm:$0xff] }
  0x32   :  { %1124 = vmatprep.subr.bf16.mxu1 %v1123_v32  ;;  %v1141_v29 = vpack.c.bf16 %v147_v27, %v146_v26  ;;  %v164_v32 = vld [vmem:[%s1796_s3] sm:$0xff]  ;;  %v167_v37 = vld [vmem:[%s1796_s3 + $0x18] sm:$0xff]  ;;  %v170_v42 = vld [vmem:[%s1796_s3 + $0x30] sm:$0xff] }
  0x33   :  { %1094 = vmatpush3.bf16.msra.mxu0 %v1093_v41  ;;  %v1144_v36 = vpack.c.bf16 %v165_v33, %v164_v32  ;;  %v1147_v38 = vpack.c.bf16 %v167_v37, %v166_v34  ;;  %v1150_v41 = vpack.c.bf16 %v169_v40, %v168_v39  ;;  %v171_v43 = vld [vmem:[%s1796_s3 + $0x38] sm:$0xff]  ;;  %v174_v48 = vld [vmem:[%s1796_s3 + $0x50] sm:$0xff]  ;;  %v177_v52 = vld [vmem:[%s1796_s3 + $0x68] sm:$0xff] }
  0x34   :  { %1096 = vmatprep.subr.bf16.mxu0 %v1095_v46  ;;  %v1153_v44 = vpack.c.bf16 %v171_v43, %v170_v42  ;;  %v173_v46 = vld [vmem:[%s1796_s3 + $0x48] sm:$0xff]  ;;  %v1162_v53 = vpack.c.bf16 %v177_v52, %v176_v51  ;;  %v180_v58 = vld [vmem:[%s1798_s5] sm:$0xff]  ;;  %v182_v60 = vld [vmem:[%s1798_s5 + $0x10] sm:$0xff] }
  0x35   :  { %1126 = vmatpush3.bf16.msra.mxu1 %v1125_v45  ;;  %v172_v45 = vld [vmem:[%s1796_s3 + $0x40] sm:$0xff]  ;;  %v181_v59 = vld [vmem:[%s1798_s5 + $0x8] sm:$0xff]  ;;  %v183_v62 = vld [vmem:[%s1798_s5 + $0x18] sm:$0xff] }
  0x36   :  { %1128 = vmatprep.subr.bf16.mxu1 %v1127_v49  ;;  %v1156_v47 = vpack.c.bf16 %v173_v46, %v172_v45  ;;  %v175_v49 = vld [vmem:[%s1796_s3 + $0x58] sm:$0xff]  ;;  %v1168_v61 = vpack.c.bf16 %v181_v59, %v180_v58  ;;  %v1171_v63 = vpack.c.bf16 %v183_v62, %v182_v60  ;;  %v185_v1 = vld [vmem:[%s1798_s5 + $0x28] sm:$0xff]  ;;  %v186_v3 = vld [vmem:[%s1798_s5 + $0x30] sm:$0xff] }
  0x37   :  { %1098 = vmatpush3.bf16.msra.mxu0 %v1097_v54  ;;  %v1159_v50 = vpack.c.bf16 %v175_v49, %v174_v48  ;;  %v178_v54 = vld [vmem:[%s1796_s3 + $0x70] sm:$0xff]  ;;  %v187_v4 = vld [vmem:[%s1798_s5 + $0x38] sm:$0xff]  ;;  %v188_v5 = vld [vmem:[%s1798_s5 + $0x40] sm:$0xff] }
  0x38   :  { %1100 = vmatprep.subr.bf16.mxu0 %v1099_v56  ;;  %v1177_v22 = vpack.c.bf16 %v187_v4, %v186_v3  ;;  %v189_v6 = vld [vmem:[%s1798_s5 + $0x48] sm:$0xff]  ;;  %v192_v11 = vld [vmem:[%s1798_s5 + $0x60] sm:$0xff]  ;;  %v194_v33 = vld [vmem:[%s1798_s5 + $0x70] sm:$0xff] }
  0x39   :  { %1130 = vmatpush3.bf16.msra.mxu1 %v1129_v55  ;;  %v179_v55 = vld [vmem:[%s1796_s3 + $0x78] sm:$0xff]  ;;  %v193_v12 = vld [vmem:[%s1798_s5 + $0x68] sm:$0xff]  ;;  %v768_v15 = vld [vmem:[%s1795_s2] ss:$0 sm:$0xff] }
  0x3a   :  { %1132 = vmatprep.subr.bf16.mxu1 %v1131_v0  ;;  %v1165_v56 = vpack.c.bf16 %v179_v55, %v178_v54  ;;  %v184_v0 = vld [vmem:[%s1798_s5 + $0x20] sm:$0xff]  ;;  %v195_v34 = vld [vmem:[%s1798_s5 + $0x78] sm:$0xff] }
  0x3b   :  { %1102 = vmatpush3.bf16.msra.mxu0 %v1101_v7  ;;  %v1174_v2 = vpack.c.bf16 %v185_v1, %v184_v0  ;;  %v1180_v7 = vpack.c.bf16 %v189_v6, %v188_v5 }
  0x3c   :  { %1104 = vmatprep.subr.bf16.mxu0 %v1103_v9  ;;  %v191_v9 = vld [vmem:[%s1798_s5 + $0x58] sm:$0xff] }
  0x3d   :  { %1134 = vmatpush3.bf16.msra.mxu1 %v1133_v8  ;;  %v190_v8 = vld [vmem:[%s1798_s5 + $0x50] sm:$0xff] }
  0x3e   :  { %1136 = vmatprep.subr.bf16.mxu1 %v1135_v13  ;;  %v1183_v10 = vpack.c.bf16 %v191_v9, %v190_v8  ;;  %v1186_v13 = vpack.c.bf16 %v193_v12, %v192_v11 }
  0x3f   :  { %1106 = vmatpush3.bf16.msra.mxu0 %v1105_v19 }
  0x40   :  { %1108 = vmatprep.subr.bf16.mxu0 %v1107_v21 }
  0x41   :  { %1138 = vmatpush3.bf16.msra.mxu1 %v1137_v20 }
  0x42   :  { %1140 = vmatprep.subr.bf16.mxu1 %v1139_v25 }
  0x43   :  { %1110 = vmatpush3.bf16.msra.mxu0 %v1109_v28 }
  0x44   :  { %1143 = vmatprep.subr.bf16.mxu0 %v1208_v35 }
  0x45   :  { %1142 = vmatpush3.bf16.msra.mxu1 %v1141_v29 }
  0x46   :  { %496 = vmatmul.mubr.f32.vlgmr.msra.gmra.mrb[2].mxu0 %v279_v30  ;;  %1167 = vmatprep.subr.bf16.mxu1 %v1208_v35 }
  0x47   :  { %1145 = vmatpush3.bf16.msra.mxu0 %v1144_v36  ;;  %977 = vmatprep.mubr.msk.f32.mxu0 %vm1209_vm0, %v1210_v57  ;;  %v769_v36 = vld [vmem:[%s1797_s4] ss:$0 sm:$0xff] }
  0x48   :  { %566 = vmatmul.mubr.f32.vlgmr.msra.gmra.mrb[2].mxu1 %v281_v31  ;;  %1146 = vmatprep.subr.bf16.mxu0 %v1208_v35 }
  0x49   :  { %1012 = vmatprep.mubr.msk.f32.mxu1 %vm1209_vm0, %v1210_v57  ;;  %1169 = vmatpush3.bf16.msra.mxu1 %v1168_v61 }
  0x4a   :  { %1170 = vmatprep.subr.bf16.mxu1 %v1208_v35 }
  0x4b   :  { %1148 = vmatpush3.bf16.msra.mxu0 %v1147_v38 }
  0x4c   :  { %1149 = vmatprep.subr.bf16.mxu0 %v1208_v35 }
  0x4d   :  { %1172 = vmatpush3.bf16.msra.mxu1 %v1171_v63 }
  0x4e   :  { %1173 = vmatprep.subr.bf16.mxu1 %v1208_v35 }
  0x4f   :  { %1151 = vmatpush3.bf16.msra.mxu0 %v1150_v41  ;;  %v770_v41 = vld [vmem:[#allocation2] ss:$0 sm:$0xff] }
  0x50   :  { %1152 = vmatprep.subr.bf16.mxu0 %v1208_v35 }
  0x51   :  { %1175 = vmatpush3.bf16.msra.mxu1 %v1174_v2 }
  0x52   :  { %1176 = vmatprep.subr.bf16.mxu1 %v1208_v35 }
  0x53   :  { %1154 = vmatpush3.bf16.msra.mxu0 %v1153_v44 }
  0x54   :  { %1155 = vmatprep.subr.bf16.mxu0 %v1208_v35 }
  0x55   :  { %1178 = vmatpush3.bf16.msra.mxu1 %v1177_v22 }
  0x56   :  { %1179 = vmatprep.subr.bf16.mxu1 %v1208_v35 }
  0x57   :  { %1157 = vmatpush3.bf16.msra.mxu0 %v1156_v47 }
  0x58   :  { %1158 = vmatprep.subr.bf16.mxu0 %v1208_v35 }
  0x59   :  { %1181 = vmatpush3.bf16.msra.mxu1 %v1180_v7 }
  0x5a   :  { %1182 = vmatprep.subr.bf16.mxu1 %v1208_v35 }
  0x5b   :  { %1160 = vmatpush3.bf16.msra.mxu0 %v1159_v50 }
  0x5c   :  { %1161 = vmatprep.subr.bf16.mxu0 %v1208_v35 }
  0x5d   :  { %1184 = vmatpush3.bf16.msra.mxu1 %v1183_v10 }
  0x5e   :  { %1185 = vmatprep.subr.bf16.mxu1 %v1208_v35 }
  0x5f   :  { %1163 = vmatpush3.bf16.msra.mxu0 %v1162_v53 }
  0x60   :  { %1164 = vmatprep.subr.bf16.mxu0 %v1208_v35 }
  0x61   :  { %1187 = vmatpush3.bf16.msra.mxu1 %v1186_v13 }
  0x62   :  { %1188 = vmatprep.subr.bf16.mxu1 %v1208_v35  ;;  %v1189_v35 = vpack.c.bf16 %v195_v34, %v194_v33 }
  0x63   :  { %1166 = vmatpush3.bf16.msra.mxu0 %v1165_v56 }
  0x65   :  { %1190 = vmatpush3.bf16.msra.mxu1 %v1189_v35 }
  0xf9   :  { %v803_v14 = vpop.f32.mrb[0].mxu0 }
  0xfa   :  { %v804_v16 = vpop.f32.mrb[1].mxu0 }
  0xfb   :  { %v838_v17 = vpop.f32.mrb[0].mxu1  ;;  %v805_v18 = vadd.f32 %v804_v16, %v803_v14 }
  0xfc   :  { %v839_v19 = vpop.f32.mrb[1].mxu1 }
  0xfd   :  { %v840_v20 = vadd.f32 %v839_v19, %v838_v17  ;;  %v358_v21 = vadd.f32 %v805_v18, %v768_v15 }
  0xff   :  { %v428_v23 = vadd.f32 %v840_v20, %v358_v21 }
 0x119   :  { %v873_v24 = vpop.f32.mrb[2].mxu0 }
 0x11a   :  { %v874_v25 = vpop.f32.mrb[3].mxu0 }
 0x11b   :  { %v908_v26 = vpop.f32.mrb[2].mxu1  ;;  %v875_v27 = vadd.f32 %v874_v25, %v873_v24 }
 0x11c   :  { %v909_v28 = vpop.f32.mrb[3].mxu1 }
 0x11d   :  { %v910_v29 = vadd.f32 %v909_v28, %v908_v26  ;;  %v498_v30 = vadd.f32 %v875_v27, %v428_v23 }
 0x11f   :  { %v568_v31 = vadd.f32 %v910_v29, %v498_v30 }
 0x121   :  { %v571_v32 = vmax.f32 %v568_v31, 0.0 }
 0x123   :  { %978 = vmatmul.mubr.f32.vlgmr.msra.gmra.mrb[4].mxu0 %v571_v32 }
 0x1f6   :  { %v645_v37 = vpop.f32.mrb[4].mxu0 }
 0x1f7   :  { %v646_v38 = vadd.f32 %v769_v36, %v645_v37  ;;  %v979_v39 = vpop.f32.mrb[5].mxu0 }
 0x1f9   :  { %v649_v40 = vmax.f32 %v646_v38, 0.0 }
 0x1fb   :  { %1013 = vmatmul.mubr.f32.vlgmr.msra.gmra.mrb[4].mxu1 %v649_v40 }
 0x2ce   :  { %v723_v42 = vpop.f32.mrb[4].mxu1 }
 0x2cf   :  { %v724_v43 = vadd.f32 %v770_v41, %v723_v42  ;;  %v1014_v44 = vpop.f32.mrb[5].mxu1 }
 0x2d1   :  { %728 = vst.msk [vmem:[#allocation3] sm:$0xff] %vm727_vm1, %v724_v43 }
 0x2d8   :  { %v746_v45 = vld [vmem:[#allocation3] sm:$0x3] }
 0x2d9   :  { %747 = vst [vmem:[%s1800_s7] sm:$0x3] %v746_v45 }

</bundles_post_ra>
